<compile_context>
chip_gen: v5e
topology: v5e:2x2
jax: 0.10.0
libtpu: 0.0.40
codegen_flags: <defaults>
</compile_context>

<pallas_src>
import functools
import math

import jax
import jax.numpy as jnp
from jax.experimental import pallas as pl
from jax.experimental.pallas import tpu as pltpu

NEG_SLOPE = 0.2
ACT_SCALE = math.sqrt(2.0)  # FusedLeakyReLU scale


def _round_up(x, m):
    return ((x + m - 1) // m) * m


def _fold_layer(z, params):
    """Fold style modulation + demodulation into a per-batch folded weight."""
    weight = params["weight"]          # (Cout, Cin)   conv weight, k=1
    mod_w = params["mod_w"]            # (Cin, style_dim)  EqualLinear weight
    mod_b = params["mod_b"]            # (Cin,)  bias_init = 1
    cin = weight.shape[1]
    sd = mod_w.shape[1]
    style = z @ mod_w.T * (1.0 / math.sqrt(sd)) + mod_b           # (B, Cin)
    w_s = weight * (1.0 / math.sqrt(cin))                         # equalized lr
    wmod = w_s[None, :, :] * style[:, None, :]                    # (B, Cout, Cin)
    demod = jax.lax.rsqrt(jnp.sum(wmod * wmod, axis=2, keepdims=True) + 1e-8)
    return wmod * demod                                           # (B, Cout, Cin)


def _fused_mlp_kernel(x_ref, w0_ref, wr_ref, b_ref, o_ref, *, num_layers, c_out):
    # x_ref : (1, Cin, TN)          f32 input tile (one batch, NCW)
    # w0_ref: (1, Cpad, Cin)        bf16 folded first-layer weight (this batch)
    # wr_ref: (L-1, 1, Cpad, Cpad)  bf16 folded weights of layers 1..L-1
    # b_ref : (L, Cpad, 1)          f32 FusedLeakyReLU biases (zero-padded)
    # o_ref : (1, Cout, TN)         f32 output tile
    x = x_ref[0].astype(jnp.bfloat16)                                # (Cin, TN)
    y = jnp.dot(w0_ref[0], x, preferred_element_type=jnp.float32)    # (Cpad, TN)
    y = y + b_ref[0]
    h = jnp.where(y >= 0.0, y, NEG_SLOPE * y) * ACT_SCALE
    # Remaining layers: activation stays VMEM-resident, static unroll (L small).
    for l in range(1, num_layers):
        y = jnp.dot(wr_ref[l - 1, 0], h.astype(jnp.bfloat16),
                    preferred_element_type=jnp.float32)              # (Cpad, TN)
        y = y + b_ref[l]
        h = jnp.where(y >= 0.0, y, NEG_SLOPE * y) * ACT_SCALE
    o_ref[0] = h[0:c_out, :].astype(o_ref.dtype)


def styled_mlp_forward(x, z, layer_params):
    """x: (B, Cin, N) NCW like torch Conv1d. z: (B, style_dim). -> (B, Cout, N)."""
    B, c_in, N = x.shape
    L = len(layer_params)
    assert L >= 2, "StyledMLP always builds at least 2 StyledConv1d layers"
    c_outs = [p["weight"].shape[0] for p in layer_params]
    c_out = c_outs[-1]
    c_pad = _round_up(max(c_outs), 128)          # lane/MXU-aligned channel pad

    # Point-axis tile: multiple of 128 (lane-dense stores); grow up to 1024 to
    # amortize per-grid-step overhead while keeping tiles tiny even on v7x's
    # 64 MiB VMEM (activation tile is c_pad * TN * 4 bytes).
    tn = min(1024, _round_up(N, 128))
    n_pad = _round_up(N, tn)

    # ---- tiny per-batch prologue (independent of N): fold style/demod ----
    folded = [_fold_layer(z, p) for p in layer_params]               # (B, co, ci)

    w0 = folded[0]                                                   # (B, c1, Cin)
    w0 = jnp.pad(w0, ((0, 0), (0, c_pad - w0.shape[1]), (0, 0)))
    w0 = w0.astype(jnp.bfloat16)                                     # (B, Cpad, Cin)

    wr = [jnp.pad(w, ((0, 0), (0, c_pad - w.shape[1]), (0, c_pad - w.shape[2])))
          for w in folded[1:]]
    wr = jnp.stack(wr, axis=0).astype(jnp.bfloat16)                  # (L-1, B, Cpad, Cpad)

    b_all = jnp.stack(
        [jnp.pad(p["act_bias"], (0, c_pad - p["act_bias"].shape[0]))
         for p in layer_params], axis=0)                             # (L, Cpad)
    b_all = b_all[:, :, None].astype(jnp.float32)                    # (L, Cpad, 1)

    x_p = x if n_pad == N else jnp.pad(x, ((0, 0), (0, 0), (0, n_pad - N)))

    kernel = functools.partial(_fused_mlp_kernel, num_layers=L, c_out=c_out)

    out = pl.pallas_call(
        kernel,
        out_shape=jax.ShapeDtypeStruct((B, c_out, n_pad), x.dtype),
        grid_spec=pltpu.PrefetchScalarGridSpec(
            num_scalar_prefetch=0,
            grid=(B, n_pad // tn),
            in_specs=[
                pl.BlockSpec((1, c_in, tn), lambda b, n: (b, 0, n)),
                # Weight / bias blocks depend only on b (inner n axis reuses
                # the VMEM copy; no re-DMA per point tile).
                pl.BlockSpec((1, c_pad, c_in), lambda b, n: (b, 0, 0)),
                pl.BlockSpec((L - 1, 1, c_pad, c_pad), lambda b, n: (0, b, 0, 0)),
                pl.BlockSpec((L, c_pad, 1), lambda b, n: (0, 0, 0)),
            ],
            out_specs=pl.BlockSpec((1, c_out, tn), lambda b, n: (b, 0, n)),
        ),
        compiler_params=pltpu.CompilerParams(
            dimension_semantics=("parallel", "parallel")),
    )(x_p, w0, wr, b_all)

    return out if n_pad == N else out[:, :, :N]


# ----------------------------------------------------------------------------
# Pure-JAX reference of the same math (f32, unfused) for correctness checking.
# ----------------------------------------------------------------------------
def _ref_forward(x, z, layer_params):
    h = x                                                            # (B, C, N)
    for p in layer_params:
        w_fold = _fold_layer(z, p)                                   # (B, Cout, Cin)
        y = jnp.einsum("boc,bcn->bon", w_fold, h) + p["act_bias"][None, :, None]
        h = jnp.where(y >= 0.0, y, NEG_SLOPE * y) * ACT_SCALE
    return h


def init_styled_mlp(key, in_dim, hidden_dim, out_dim, style_dim, num_layers):
    dims = ([(in_dim, hidden_dim)]
            + [(hidden_dim, hidden_dim)] * (num_layers - 2)
            + [(hidden_dim, out_dim)])
    params = []
    for (ci, co) in dims:
        key, k1, k2 = jax.random.split(key, 3)
        params.append({
            "weight": jax.random.normal(k1, (co, ci), jnp.float32),        # conv weight (k=1)
            "mod_w": jax.random.normal(k2, (ci, style_dim), jnp.float32),  # EqualLinear weight
            "mod_b": jnp.ones((ci,), jnp.float32),                          # bias_init = 1
            "act_bias": jnp.zeros((co,), jnp.float32),                      # FusedLeakyReLU bias
        })
    return params


if __name__ == "__main__":
    B, N = 2, 64
    in_dim, hidden_dim, out_dim, style_dim, num_layers = 8, 32, 16, 64, 3

    key = jax.random.PRNGKey(0)
    kx, kz, kp = jax.random.split(key, 3)
    x = jax.random.normal(kx, (B, in_dim, N), jnp.float32)   # NCW like torch Conv1d
    z = jax.random.normal(kz, (B, style_dim), jnp.float32)
    params = init_styled_mlp(kp, in_dim, hidden_dim, out_dim, style_dim, num_layers)

    out = jax.block_until_ready(jax.jit(styled_mlp_forward)(x, z, params))
    assert out.shape == (B, out_dim, N), out.shape

    ref = jax.block_until_ready(_ref_forward(x, z, params))
    # bf16 MXU operands vs f32 reference -> tolerance scaled to output magnitude.
    err = float(jnp.max(jnp.abs(out - ref)))
    scale = float(jnp.maximum(jnp.max(jnp.abs(ref)), 1.0))
    assert err <= 5e-2 * scale, (err, scale)

    print("KERNEL_OK")
</pallas_src>

<mosaic_0001>
module attributes {stable_mosaic.version = 11 : i64} {
  func.func @_fused_mlp_kernel(%arg0: i32, %arg1: i32, %arg2: memref<1x8x128xf32, #tpu.memory_space<vmem>>, %arg3: memref<1x128x8xbf16, #tpu.memory_space<vmem>>, %arg4: memref<2x1x128x128xbf16, #tpu.memory_space<vmem>>, %arg5: memref<3x128x1xf32, #tpu.memory_space<vmem>>, %arg6: memref<1x16x128xf32, #tpu.memory_space<vmem>>) attributes {dimension_semantics = [#tpu.dimension_semantics<parallel>, #tpu.dimension_semantics<parallel>], iteration_bounds = array<i64: 2, 1>, scalar_prefetch = 0 : i64, scratch_operands = 0 : i64, tpu.core_type = #tpu.core_type<tc>, window_params = [{transform_indices = @transform_0, window_bounds = array<i64: 1, 8, 128>}, {transform_indices = @transform_1, window_bounds = array<i64: 1, 128, 8>}, {transform_indices = @transform_2, window_bounds = array<i64: 2, 1, 128, 128>}, {pipeline_mode = #tpu.pipeline_mode<synchronous>, transform_indices = @transform_3, window_bounds = array<i64: 3, 128, 1>}, {transform_indices = @transform_4, window_bounds = array<i64: 1, 16, 128>}]} {
    %c0 = arith.constant 0 : index
    %c0_0 = arith.constant 0 : index
    %c0_1 = arith.constant 0 : index
    %0 = vector.load %arg2[%c0, %c0_0, %c0_1] : memref<1x8x128xf32, #tpu.memory_space<vmem>>, vector<1x8x128xf32>
    %1 = vector.shape_cast %0 : vector<1x8x128xf32> to vector<8x128xf32>
    %2 = arith.truncf %1 : vector<8x128xf32> to vector<8x128xbf16>
    %c0_2 = arith.constant 0 : index
    %c0_3 = arith.constant 0 : index
    %c0_4 = arith.constant 0 : index
    %3 = vector.load %arg3[%c0_2, %c0_3, %c0_4] : memref<1x128x8xbf16, #tpu.memory_space<vmem>>, vector<1x128x8xbf16>
    %4 = vector.shape_cast %3 : vector<1x128x8xbf16> to vector<128x8xbf16>
    %cst = arith.constant dense<0.000000e+00> : vector<128x128xf32>
    %5 = tpu.matmul %4, %2, %cst {dimension_numbers = #tpu.dot_dimension_numbers<[1], [0], [0], [1], [0, 0, 1, 1], [], []>} : vector<128x8xbf16>, vector<8x128xbf16>, vector<128x128xf32> -> vector<128x128xf32>
    %c0_5 = arith.constant 0 : index
    %c0_6 = arith.constant 0 : index
    %c0_7 = arith.constant 0 : index
    %6 = vector.load %arg5[%c0_5, %c0_6, %c0_7] : memref<3x128x1xf32, #tpu.memory_space<vmem>>, vector<1x128x1xf32>
    %7 = vector.shape_cast %6 : vector<1x128x1xf32> to vector<128x1xf32>
    %8 = vector.broadcast %7 : vector<128x1xf32> to vector<128x128xf32>
    %9 = arith.addf %5, %8 : vector<128x128xf32>
    %cst_8 = arith.constant 0.000000e+00 : f32
    %10 = vector.broadcast %cst_8 : f32 to vector<128x128xf32>
    %11 = arith.cmpf oge, %9, %10 : vector<128x128xf32>
    %cst_9 = arith.constant 2.000000e-01 : f32
    %12 = vector.broadcast %cst_9 : f32 to vector<128x128xf32>
    %13 = arith.mulf %12, %9 : vector<128x128xf32>
    %14 = arith.select %11, %9, %13 : vector<128x128xi1>, vector<128x128xf32>
    %cst_10 = arith.constant 1.41421354 : f32
    %15 = vector.broadcast %cst_10 : f32 to vector<128x128xf32>
    %16 = arith.mulf %14, %15 : vector<128x128xf32>
    %c0_11 = arith.constant 0 : index
    %c0_12 = arith.constant 0 : index
    %c0_13 = arith.constant 0 : index
    %c0_14 = arith.constant 0 : index
    %17 = vector.load %arg4[%c0_11, %c0_12, %c0_13, %c0_14] : memref<2x1x128x128xbf16, #tpu.memory_space<vmem>>, vector<1x1x128x128xbf16>
    %18 = vector.shape_cast %17 : vector<1x1x128x128xbf16> to vector<128x128xbf16>
    %19 = arith.truncf %16 : vector<128x128xf32> to vector<128x128xbf16>
    %cst_15 = arith.constant dense<0.000000e+00> : vector<128x128xf32>
    %20 = tpu.matmul %18, %19, %cst_15 {dimension_numbers = #tpu.dot_dimension_numbers<[1], [0], [0], [1], [0, 0, 1, 1], [], []>} : vector<128x128xbf16>, vector<128x128xbf16>, vector<128x128xf32> -> vector<128x128xf32>
    %c1 = arith.constant 1 : index
    %c0_16 = arith.constant 0 : index
    %c0_17 = arith.constant 0 : index
    %21 = vector.load %arg5[%c1, %c0_16, %c0_17] : memref<3x128x1xf32, #tpu.memory_space<vmem>>, vector<1x128x1xf32>
    %22 = vector.shape_cast %21 : vector<1x128x1xf32> to vector<128x1xf32>
    %23 = vector.broadcast %22 : vector<128x1xf32> to vector<128x128xf32>
    %24 = arith.addf %20, %23 : vector<128x128xf32>
    %cst_18 = arith.constant 0.000000e+00 : f32
    %25 = vector.broadcast %cst_18 : f32 to vector<128x128xf32>
    %26 = arith.cmpf oge, %24, %25 : vector<128x128xf32>
    %cst_19 = arith.constant 2.000000e-01 : f32
    %27 = vector.broadcast %cst_19 : f32 to vector<128x128xf32>
    %28 = arith.mulf %27, %24 : vector<128x128xf32>
    %29 = arith.select %26, %24, %28 : vector<128x128xi1>, vector<128x128xf32>
    %cst_20 = arith.constant 1.41421354 : f32
    %30 = vector.broadcast %cst_20 : f32 to vector<128x128xf32>
    %31 = arith.mulf %29, %30 : vector<128x128xf32>
    %c1_21 = arith.constant 1 : index
    %c0_22 = arith.constant 0 : index
    %c0_23 = arith.constant 0 : index
    %c0_24 = arith.constant 0 : index
    %32 = vector.load %arg4[%c1_21, %c0_22, %c0_23, %c0_24] : memref<2x1x128x128xbf16, #tpu.memory_space<vmem>>, vector<1x1x128x128xbf16>
    %33 = vector.shape_cast %32 : vector<1x1x128x128xbf16> to vector<128x128xbf16>
    %34 = arith.truncf %31 : vector<128x128xf32> to vector<128x128xbf16>
    %cst_25 = arith.constant dense<0.000000e+00> : vector<128x128xf32>
    %35 = tpu.matmul %33, %34, %cst_25 {dimension_numbers = #tpu.dot_dimension_numbers<[1], [0], [0], [1], [0, 0, 1, 1], [], []>} : vector<128x128xbf16>, vector<128x128xbf16>, vector<128x128xf32> -> vector<128x128xf32>
    %c2 = arith.constant 2 : index
    %c0_26 = arith.constant 0 : index
    %c0_27 = arith.constant 0 : index
    %36 = vector.load %arg5[%c2, %c0_26, %c0_27] : memref<3x128x1xf32, #tpu.memory_space<vmem>>, vector<1x128x1xf32>
    %37 = vector.shape_cast %36 : vector<1x128x1xf32> to vector<128x1xf32>
    %38 = vector.broadcast %37 : vector<128x1xf32> to vector<128x128xf32>
    %39 = arith.addf %35, %38 : vector<128x128xf32>
    %cst_28 = arith.constant 0.000000e+00 : f32
    %40 = vector.broadcast %cst_28 : f32 to vector<128x128xf32>
    %41 = arith.cmpf oge, %39, %40 : vector<128x128xf32>
    %cst_29 = arith.constant 2.000000e-01 : f32
    %42 = vector.broadcast %cst_29 : f32 to vector<128x128xf32>
    %43 = arith.mulf %42, %39 : vector<128x128xf32>
    %44 = arith.select %41, %39, %43 : vector<128x128xi1>, vector<128x128xf32>
    %cst_30 = arith.constant 1.41421354 : f32
    %45 = vector.broadcast %cst_30 : f32 to vector<128x128xf32>
    %46 = arith.mulf %44, %45 : vector<128x128xf32>
    %47 = vector.extract_strided_slice %46 {offsets = [0, 0], sizes = [16, 128], strides = [1, 1]} : vector<128x128xf32> to vector<16x128xf32>
    %c0_31 = arith.constant 0 : index
    %c0_32 = arith.constant 0 : index
    %c0_33 = arith.constant 0 : index
    %48 = vector.load %arg6[%c0_31, %c0_32, %c0_33] : memref<1x16x128xf32, #tpu.memory_space<vmem>>, vector<1x16x128xf32>
    %49 = vector.shape_cast %48 : vector<1x16x128xf32> to vector<16x128xf32>
    %50 = vector.shape_cast %47 : vector<16x128xf32> to vector<1x16x128xf32>
    tpu.vector_store %arg6[%c0_31, %c0_32, %c0_33], %50 {strides = array<i32>} : memref<1x16x128xf32, #tpu.memory_space<vmem>>, vector<1x16x128xf32>,
    return
  }
  func.func @transform_0(%arg0: i32, %arg1: i32) -> (i32, i32, i32) {
    %c0_i32 = arith.constant 0 : i32
    %c0_i32_0 = arith.constant 0 : i32
    return %arg0, %c0_i32, %arg1 : i32, i32, i32
  }
  func.func @transform_1(%arg0: i32, %arg1: i32) -> (i32, i32, i32) {
    %c0_i32 = arith.constant 0 : i32
    %c0_i32_0 = arith.constant 0 : i32
    %c0_i32_1 = arith.constant 0 : i32
    return %arg0, %c0_i32, %c0_i32_0 : i32, i32, i32
  }
  func.func @transform_2(%arg0: i32, %arg1: i32) -> (i32, i32, i32, i32) {
    %c0_i32 = arith.constant 0 : i32
    %c0_i32_0 = arith.constant 0 : i32
    %c0_i32_1 = arith.constant 0 : i32
    %c0_i32_2 = arith.constant 0 : i32
    return %c0_i32, %arg0, %c0_i32_0, %c0_i32_1 : i32, i32, i32, i32
  }
  func.func @transform_3(%arg0: i32, %arg1: i32) -> (i32, i32, i32) {
    %c0_i32 = arith.constant 0 : i32
    %c0_i32_0 = arith.constant 0 : i32
    %c0_i32_1 = arith.constant 0 : i32
    %c0_i32_2 = arith.constant 0 : i32
    return %c0_i32, %c0_i32_0, %c0_i32_1 : i32, i32, i32
  }
  func.func @transform_4(%arg0: i32, %arg1: i32) -> (i32, i32, i32) {
    %c0_i32 = arith.constant 0 : i32
    %c0_i32_0 = arith.constant 0 : i32
    return %arg0, %c0_i32, %arg1 : i32, i32, i32
  }
}

</mosaic_0001>

<bundles_post_ra>
// kernel: styled_mlp_forward.1
= control target key start
LH: loop header
LB: loop body
LE: loop exit
PB: predicated region body
PF: predicated region fallthrough
CT: control target
= control target key end

     0   :  { %9 = vsyncpa [#allocation4], 0  ;;  %s2049_s0 = inlined_call_operand.vmem [shape: f32[2,8,128], index: 0, kind: input, shape index: {}]   ;;  %s2050_s1 = inlined_call_operand.vmem [shape: bf16[2,128,8], index: 1, kind: input, shape index: {}]   ;;  %s2051_s2 = inlined_call_operand.vmem [shape: bf16[2,2,128,128], index: 2, kind: input, shape index: {}]   ;;  %s2052_s3 = inlined_call_operand.vmem [shape: f32[3,128,1], index: 3, kind: input, shape index: {}]   ;;  %s2053_s4 = inlined_call_operand.hbm [shape: f32[2,16,128], index: 4, kind: output, shape index: {}]  }
   0x1   :  { %11 = vsyncpa [#allocation4 + $0x1], 0  ;;  %s1710_s15 = smov 0   ;;  %s1712_s16 = smov 0  }
   0x2   :  { %s1714_s17 = smov 0   ;;  %s1716_s18 = smov 0  }
   0x3   :  { %s1718_s19 = smov 0   ;;  %s1720_s20 = smov 0  }
   0x4 LB: > { %s1328_s21 = sadd.s32 4294967295, %s1680_s20   ;;  %s1329_s22 = sadd.s32 4294967294, %s1680_s20   ;;  %s1680_s20 = sphi %s1720_s20, %s17_s20   ;;  %s1676_s19 = sphi %s1718_s19, %s2060_s19   ;;  %s1672_s18 = sphi %s1716_s18, %s2059_s18   ;;  %s1668_s17 = sphi %s1714_s17, %s2058_s17   ;;  %s1664_s16 = sphi %s1712_s16, %s2057_s16   ;;  %s1660_s15 = sphi %s1710_s15, %s2056_s15  }
   0x5   : > { %s29_s23 = sadd.s32 1, %s1676_s19  ;;  %s90_s24 = sadd.s32 1, %s1668_s17 }
   0x6   : > { %p31_p0 = scmp.ge.s32.totalorder %s29_s23, 2  ;;  %p97_p1 = scmp.ne.s32.totalorder %s1668_s17, %s1664_s16 }
   0x7   : > { %p98_p2 = scmp.eq.s32.totalorder %s1680_s20, 0  ;;  %p150_p3 = scmp.eq.s32.totalorder %s1328_s21, 1 }
   0x8   : > { %s2062_s23 = smov (%p31_p0, %s29_s23), 0  ;;  %p155_p6 = scmp.ne.s32.totalorder %s1664_s16, %s1660_s15 }
   0x9   : > { %p99_p4 = por %p98_p2, %p97_p1  ;;  %p1749_p5 = por %p150_p3, %p97_p1 }
   0xa   : > { %s87_s26 = ssub.s32 %s1676_s19, %s2062_s23  ;;  %p156_p8 = scmp.eq.s32.totalorder %s1329_s22, 1 }
   0xb   : > { %p88_p7 = scmp.eq.s32.totalorder %s87_s26, 0  ;;  %p1331_p10 = scmp.ge.s32.totalorder %s1680_s20, 2 }
   0xc   : > { %p1760_p9 = por %p156_p8, %p155_p6 }
   0xd   : > { %s1758_s27 = scalar_select %p88_p7, %s1668_s17, %s90_s24  }
   0xe   : > { %175 = sbr.rel (%p1331_p10) target bundleno = 39 (0x27), region = 20 }
  0x13   : > { %196 = sbr.rel (!%p99_p4) target bundleno = 39 (0x27), region = 32  ;;  %s198_s29 = sand.u32 (%p99_p4), 1, %s1668_s17  }
  0x14   : > { %s1498_s30 = sshll.u32 (%p99_p4), %s1676_s19, 6  ;;  %s1332_s5 = sshll.u32 (%p99_p4), %s198_s29, 7 }
  0x15   : > { %s1772_s8 = scalar_lea.vmem (%p99_p4), %s2051_s2, %s1498_s30  ;;  %s200_s9 = scalar_lea.vmem (%p99_p4), [#allocation2], %s1332_s5 }
  0x16   : > { %v220_v0 = vld [vmem:[%s1772_s8] sm:$0xff] (%p99_p4)   ;;  %v224_v1 = vld [vmem:[%s1772_s8 + $0x8] sm:$0xff] (%p99_p4)   ;;  %v228_v2 = vld [vmem:[%s1772_s8 + $0x10] sm:$0xff] (%p99_p4)  }
  0x17   : > { %221 = vst [vmem:[%s200_s9] sm:$0xff] (%p99_p4), %v220_v0   ;;  %v232_v3 = vld [vmem:[%s1772_s8 + $0x18] sm:$0xff] (%p99_p4)   ;;  %v236_v4 = vld [vmem:[%s1772_s8 + $0x20] sm:$0xff] (%p99_p4)   ;;  %v240_v5 = vld [vmem:[%s1772_s8 + $0x28] sm:$0xff] (%p99_p4)  }
  0x18   : > { %225 = vst [vmem:[%s200_s9 + $0x8] sm:$0xff] %v224_v1   ;;  %v244_v6 = vld [vmem:[%s1772_s8 + $0x30] sm:$0xff]   ;;  %v248_v7 = vld [vmem:[%s1772_s8 + $0x38] sm:$0xff]   ;;  %v252_v8 = vld [vmem:[%s1772_s8 + $0x80] sm:$0xff]  }
  0x19   : > { %229 = vst [vmem:[%s200_s9 + $0x10] sm:$0xff] %v228_v2   ;;  %v256_v9 = vld [vmem:[%s1772_s8 + $0x88] sm:$0xff]   ;;  %v260_v10 = vld [vmem:[%s1772_s8 + $0x90] sm:$0xff]   ;;  %v264_v11 = vld [vmem:[%s1772_s8 + $0x98] sm:$0xff]  }
  0x1a   : > { %233 = vst [vmem:[%s200_s9 + $0x18] sm:$0xff] %v232_v3   ;;  %v268_v12 = vld [vmem:[%s1772_s8 + $0xa0] sm:$0xff]   ;;  %v272_v13 = vld [vmem:[%s1772_s8 + $0xa8] sm:$0xff]   ;;  %v276_v14 = vld [vmem:[%s1772_s8 + $0xb0] sm:$0xff]  }
  0x1b   : > { %237 = vst [vmem:[%s200_s9 + $0x20] sm:$0xff] %v236_v4   ;;  %v280_v15 = vld [vmem:[%s1772_s8 + $0xb8] sm:$0xff]  }
  0x1c   : > { %241 = vst [vmem:[%s200_s9 + $0x28] sm:$0xff] %v240_v5  }
  0x1d   : > { %245 = vst [vmem:[%s200_s9 + $0x30] sm:$0xff] %v244_v6  }
  0x1e   : > { %249 = vst [vmem:[%s200_s9 + $0x38] sm:$0xff] %v248_v7  }
  0x1f   : > { %253 = vst [vmem:[%s200_s9 + $0x40] sm:$0xff] %v252_v8  }
  0x20   : > { %257 = vst [vmem:[%s200_s9 + $0x48] sm:$0xff] %v256_v9  }
  0x21   : > { %261 = vst [vmem:[%s200_s9 + $0x50] sm:$0xff] %v260_v10  }
  0x22   : > { %265 = vst [vmem:[%s200_s9 + $0x58] sm:$0xff] %v264_v11  }
  0x23   : > { %269 = vst [vmem:[%s200_s9 + $0x60] sm:$0xff] %v268_v12  }
  0x24   : > { %273 = vst [vmem:[%s200_s9 + $0x68] sm:$0xff] %v272_v13  }
  0x25   : > { %277 = vst [vmem:[%s200_s9 + $0x70] sm:$0xff] %v276_v14  }
  0x26   : > { %281 = vst [vmem:[%s200_s9 + $0x78] sm:$0xff] %v280_v15  }
  0x27 PF: > { %p1335_p11 = scmp.ge.s32.totalorder %s1680_s20, 1  ;;  %p370_p12 = scmp.lt.s32.totalorder %s1680_s20, 3 }
  0x29   : > { %p371_p13 = pnand %p1335_p11, %p370_p12 }
  0x2a   : > { %p414_p0 = scmp.lt.s32.totalorder (!%p371_p13), %s1672_s18, 1  ;;  %s1524_s14 = sshll.u32 (!%p371_p13), %s1672_s18, 4 }
  0x2b   : > { %374 = sbr.rel (%p371_p13) target bundleno = 812 (0x32c), region = 73  ;;  %s1622_s10 = scalar_lea.hbm (!%p371_p13), %s2053_s4, 32 }
  0x30   : > { %v459_v16 = vld [vmem:[%s2052_s3 + $0x70] sm:$0xff]  ;;  %v1682_v17 = vmov 0   ;;  %v457_v18 = vld [vmem:[%s2052_s3 + $0x60] sm:$0xff]  ;;  %s415_s22 = scalar_select %p414_p0, %s1672_s18, 1  ;;  %vm606_vm0 = vcmask 1043456   ;;  %v460_v21 = vld [vmem:[%s2052_s3 + $0x78] sm:$0xff] }
  0x31   : > { %1599 = vset.pattern.permute.xlu0 %v1682_v17  ;;  %1601 = vset.pattern.permute.xlu2 %v1682_v17  ;;  %v455_v19 = vld [vmem:[%s2052_s3 + $0x50] sm:$0xff]  ;;  %v458_v23 = vld [vmem:[%s2052_s3 + $0x68] sm:$0xff]  ;;  %v456_v24 = vld [vmem:[%s2052_s3 + $0x58] sm:$0xff]  ;;  %vm581_vm1 = vcmask 64512  }
  0x32   : > { %533 = vperm.xlu0 %1599, %v459_v16   ;;  %1600 = vset.pattern.permute.xlu1 %v1682_v17  ;;  %s1338_s24 = sshll.u32 %s415_s22, 3  ;;  %s1499_s26 = sshll.u32 %s415_s22, 6  ;;  %v453_v27 = vld [vmem:[%s2052_s3 + $0x40] sm:$0xff]  ;;  %v454_v28 = vld [vmem:[%s2052_s3 + $0x48] sm:$0xff]  ;;  %v451_v29 = vld [vmem:[%s2052_s3 + $0x30] sm:$0xff] }
  0x33   : > { %523 = vperm.xlu1 %1600, %v457_v18   ;;  %513 = vperm.xlu2 %1601, %v455_v19   ;;  %s420_s5 = scalar_lea.vmem %s2049_s0, %s1338_s24  ;;  %s1809_s8 = scalar_lea.vmem %s2050_s1, %s1499_s26  ;;  %v452_v30 = vld [vmem:[%s2052_s3 + $0x38] sm:$0xff]  ;;  %v450_v31 = vld [vmem:[%s2052_s3 + $0x28] sm:$0xff]  ;;  %v449_v32 = vld [vmem:[%s2052_s3 + $0x20] sm:$0xff] }
  0x34   : > { %v427_v20 = vld [vmem:[%s420_s5] sm:$0xff]  ;;  %v1501_v33 = vld [vmem:[%s1809_s8 + $0x8] sm:$0xff]  ;;  %v447_v34 = vld [vmem:[%s2052_s3 + $0x10] sm:$0xff]  ;;  %s1219_s24 = scalar_lea.hbm %s2053_s4, %s1524_s14 }
  0x35   : > { %v428_v22 = vpack.c.bf16 %v427_v20, %v427_v20  ;;  %v1500_v26 = vld [vmem:[%s1809_s8] sm:$0xff]  ;;  %v448_v35 = vld [vmem:[%s2052_s3 + $0x18] sm:$0xff]  ;;  %v446_v37 = vld [vmem:[%s2052_s3 + $0x8] sm:$0xff]  ;;  %s1222_s30 = sshll.u32 %s1219_s24, 4  ;;  %s1223_s30 = int_to_ptr.hbm [resolvable:$true] %s1222_s30 }
  0x36   : > { %v445_v36 = vld [vmem:[%s2052_s3] sm:$0xff]  ;;  %v1502_v38 = vld [vmem:[%s1809_s8 + $0x10] sm:$0xff]  ;;  %v1503_v40 = vld [vmem:[%s1809_s8 + $0x18] sm:$0xff]  ;;  %s1616_s5 = sshra.s32 %s1223_s30, 4  ;;  %s1617_s5 = int_to_ptr.hbm [resolvable:$true] %s1616_s5 }
  0x37   : > { %v608_v25 = vsel %vm606_vm0, %v428_v22, 0  ;;  %v1393_v39 = vld [vmem:[%s2052_s3 + $0xe0] sm:$0xff]  ;;  %v1395_v41 = vld [vmem:[%s2052_s3 + $0xf0] sm:$0xff]  ;;  %v1392_v42 = vld [vmem:[%s2052_s3 + $0xd8] sm:$0xff]  ;;  %s1618_s6 = scalar_lea.hbm %s1617_s5, 16  ;;  %p1623_p4 = scmp.lt.s32.totalorder %s1617_s5, %s2053_s4 }
  0x38   : > { %617 = vmatpush.bf16.msra.mxu0 %v608_v25  ;;  %v1394_v43 = vld [vmem:[%s2052_s3 + $0xe8] sm:$0xff]  ;;  %v1387_v44 = vld [vmem:[%s2052_s3 + $0xb0] sm:$0xff]  ;;  %v1504_v45 = vld [vmem:[%s1809_s8 + $0x20] sm:$0xff]  ;;  %p1619_p1 = scmp.ne.s32.totalorder %s1617_s5, %s1618_s6  ;;  %p1624_p6 = scmp.lt.s32.totalorder %s1622_s10, %s1618_s6 }
  0x39   : > { %v1389_v46 = vld [vmem:[%s2052_s3 + $0xc0] sm:$0xff]  ;;  %v1386_v47 = vld [vmem:[%s2052_s3 + $0xa8] sm:$0xff]  ;;  %v1388_v48 = vld [vmem:[%s2052_s3 + $0xb8] sm:$0xff] }
  0x3a   : > { %538 = vperm.xlu0 %1599, %v460_v21   ;;  %v1505_v49 = vld [vmem:[%s1809_s8 + $0x28] sm:$0xff]  ;;  %v1381_v50 = vld [vmem:[%s2052_s3 + $0x80] sm:$0xff]  ;;  %v1396_v51 = vld [vmem:[%s2052_s3 + $0xf8] sm:$0xff]  ;;  %p1620_p2 = pnand %p1619_p1, %p1749_p5  ;;  %p1625_p7 = por %p1624_p6, %p1623_p4 }
  0x3b   : > { %528 = vperm.xlu1 %1600, %v458_v23   ;;  %518 = vperm.xlu2 %1601, %v456_v24   ;;  %v1383_v52 = vld [vmem:[%s2052_s3 + $0x90] sm:$0xff]  ;;  %v1446_v53 = vld [vmem:[%s2052_s3 + $0x108] sm:$0xff]  ;;  %v1385_v59 = vld [vmem:[%s2052_s3 + $0xa0] sm:$0xff] }
  0x3c   : > { %1373 = vmatmul.msk.bf16.vlgmr.msra.gmra.mxu0 %vm581_vm1, %v1500_v26  ;;  %v1391_v54 = vld [vmem:[%s2052_s3 + $0xd0] sm:$0xff]  ;;  %v1382_v55 = vld [vmem:[%s2052_s3 + $0x88] sm:$0xff]  ;;  %v1507_v63 = vld [vmem:[%s1809_s8 + $0x38] sm:$0xff]  ;;  %p1621_p3 = pneg %p1620_p2 }
  0x3d   : > { %v1506_v56 = vld [vmem:[%s1809_s8 + $0x30] sm:$0xff]  ;;  %v1390_v57 = vld [vmem:[%s2052_s3 + $0xc8] sm:$0xff]  ;;  %v1384_v0 = vld [vmem:[%s2052_s3 + $0x98] sm:$0xff]  ;;  %s1951_s8 = sand.u32 1, %s1664_s16  }
  0x3e   : > { %v1445_v4 = vld [vmem:[%s2052_s3 + $0x100] sm:$0xff]  ;;  %s1336_s11 = sshll.u32 %s1951_s8, 7  ;;  %s1337_s13 = sshll.u32 %s1951_s8, 4 }
  0x3f   : > { %s1958_s12 = scalar_lea.vmem [#allocation2], %s1336_s11  ;;  %s413_s26 = scalar_lea.vmem [#allocation3], %s1337_s13 }
  0x40   : > { %s1220_s29 = sshll.u32 %s413_s26, 4  ;;  %s1207_s18 = scalar_lea.sflag [#allocation4], %s1951_s8  ;;  %s1221_s29 = int_to_ptr.vmem [resolvable:$true] %s1220_s29 }
  0x41   : > { %p1626_p8 = pnand %p1625_p7, %p1621_p3 }
  0x42   : > { %503 = vperm.xlu0 %1599, %v453_v27  }
  0x43   : > { %508 = vperm.xlu1 %1600, %v454_v28   ;;  %493 = vperm.xlu2 %1601, %v451_v29  }
  0x4a   : > { %498 = vperm.xlu0 %1599, %v452_v30  }
  0x4b   : > { %488 = vperm.xlu2 %1601, %v450_v31   ;;  %483 = vperm.xlu1 %1600, %v449_v32  }
  0x4c   : > { %1374 = vmatmul.msk.bf16.gmra.mxu0 %vm581_vm1, %v1501_v33 }
  0x52   : > { %473 = vperm.xlu0 %1599, %v447_v34  }
  0x53   : > { %478 = vperm.xlu1 %1600, %v448_v35   ;;  %463 = vperm.xlu2 %1601, %v445_v36  }
  0x5a   : > { %468 = vperm.xlu0 %1599, %v446_v37  }
  0x5b   : > { %836 = vperm.xlu1 %1600, %v1395_v41   ;;  %841 = vperm.xlu2 %1601, %v1396_v51  }
  0x5c   : > { %1375 = vmatmul.msk.bf16.gmra.mxu0 %vm581_vm1, %v1502_v38 }
  0x62   : > { %826 = vperm.xlu0 %1599, %v1393_v39  }
  0x63   : > { %831 = vperm.xlu1 %1600, %v1394_v43   ;;  %816 = vperm.xlu2 %1601, %v1391_v54  }
  0x6a   : > { %821 = vperm.xlu0 %1599, %v1392_v42  }
  0x6b   : > { %806 = vperm.xlu1 %1600, %v1389_v46   ;;  %811 = vperm.xlu2 %1601, %v1390_v57  }
  0x6c   : > { %1376 = vmatmul.msk.bf16.gmra.mxu0 %vm581_vm1, %v1503_v40 }
  0x72   : > { %796 = vperm.xlu0 %1599, %v1387_v44  }
  0x73   : > { %801 = vperm.xlu1 %1600, %v1388_v48   ;;  %786 = vperm.xlu2 %1601, %v1385_v59  }
  0x7a   : > { %791 = vperm.xlu0 %1599, %v1386_v47  }
  0x7b   : > { %776 = vperm.xlu1 %1600, %v1383_v52   ;;  %781 = vperm.xlu2 %1601, %v1384_v0  }
  0x7c   : > { %1377 = vmatmul.msk.bf16.gmra.mxu0 %vm581_vm1, %v1504_v45 }
  0x82   : > { %766 = vperm.xlu0 %1599, %v1381_v50  }
  0x83   : > { %771 = vperm.xlu1 %1600, %v1382_v55   ;;  %1049 = vperm.xlu2 %1601, %v1445_v4  }
  0x8a   : > { %1054 = vperm.xlu0 %1599, %v1446_v53  }
  0x8c   : > { %1378 = vmatmul.msk.bf16.gmra.mxu0 %vm581_vm1, %v1505_v49 }
  0x8d   : > { %v1908_v58 = vpop.permute.xlu2 %513 }
  0x95   : > { %v1916_v61 = vpop.permute.xlu2 %518 }
  0x9c   : > { %1379 = vmatmul.msk.bf16.gmra.mxu0 %vm581_vm1, %v1506_v56 }
  0x9d   : > { %v494_v2 = vpop.permute.xlu2 %493 }
  0xa4   : > { %v1914_v60 = vpop.permute.xlu0 %533 }
  0xa5   : > { %v1918_v62 = vpop.permute.xlu1 %523  ;;  %v489_v6 = vpop.permute.xlu2 %488 }
  0xac   : > { %v1924_v1 = vpop.permute.xlu0 %538  ;;  %1380 = vmatmul.msk.bf16.gmra.mxu0 %vm581_vm1, %v1507_v63 }
  0xad   : > { %v1927_v3 = vpop.permute.xlu1 %528  ;;  %v464_v11 = vpop.permute.xlu2 %463 }
  0xb4   : > { %v1932_v5 = vpop.permute.xlu0 %503 }
  0xb5   : > { %v1934_v9 = vpop.permute.xlu1 %508 }
  0xb9   : > { %v619_v7 = vpop.f32.mrf.mxu0 }
  0xba   : > { %v620_v14 = vadd.f32 %v619_v7, %v464_v11 }
  0xbc   : > { %v499_v8 = vpop.permute.xlu0 %498  ;;  %v675_v16 = vmul.f32 0.2, %v620_v14  ;;  %vm659_vm2 = vcmp.ge.f32.partialorder %v620_v14, 0.0 }
  0xbd   : > { %v484_v13 = vpop.permute.xlu1 %483 }
  0xbe   : > { %v691_v21 = vsel %vm659_vm2, %v620_v14, %v675_v16 }
  0xbf   : > { %v707_v26 = vmul.f32 1.4142135, %v691_v21 }
  0xc1   : > { %v621_v10 = vpop.f32.mrf.mxu0 }
  0xc4   : > { %v474_v12 = vpop.permute.xlu0 %473 }
  0xc5   : > { %v479_v22 = vpop.permute.xlu1 %478 }
  0xc9   : > { %v624_v15 = vpop.f32.mrf.mxu0 }
  0xca   : > { %v625_v18 = vadd.f32 %v624_v15, %v474_v12 }
  0xcc   : > { %v469_v17 = vpop.permute.xlu0 %468  ;;  %v677_v23 = vmul.f32 0.2, %v625_v18  ;;  %vm661_vm4 = vcmp.ge.f32.partialorder %v625_v18, 0.0 }
  0xcd   : > { %v622_v19 = vadd.f32 %v621_v10, %v469_v17 }
  0xce   : > { %v693_v31 = vsel %vm661_vm4, %v625_v18, %v677_v23 }
  0xcf   : > { %vm660_vm3 = vcmp.ge.f32.partialorder %v622_v19, 0.0  ;;  %v676_v20 = vmul.f32 0.2, %v622_v19  ;;  %v709_v33 = vmul.f32 1.4142135, %v693_v31 }
  0xd1   : > { %v692_v24 = vsel %vm660_vm3, %v622_v19, %v676_v20  ;;  %v626_v25 = vpop.f32.mrf.mxu0 }
  0xd2   : > { %v708_v27 = vmul.f32 1.4142135, %v692_v24  ;;  %v627_v28 = vadd.f32 %v626_v25, %v479_v22 }
  0xd4   : > { %v1936_v29 = vpack.c.bf16 %v708_v27, %v707_v26  ;;  %vm662_vm5 = vcmp.ge.f32.partialorder %v627_v28, 0.0  ;;  %v678_v30 = vmul.f32 0.2, %v627_v28 }
  0xd6   : > { %v694_v32 = vsel %vm662_vm5, %v627_v28, %v678_v30 }
  0xd7   : > { %v710_v34 = vmul.f32 1.4142135, %v694_v32 }
  0xd9   : > { %v629_v35 = vpop.f32.mrf.mxu0  ;;  %v1938_v36 = vpack.c.bf16 %v710_v34, %v709_v33 }
  0xda   : > { %v630_v37 = vadd.f32 %v629_v35, %v484_v13 }
  0xdc   : > { %v679_v38 = vmul.f32 0.2, %v630_v37  ;;  %vm663_vm6 = vcmp.ge.f32.partialorder %v630_v37, 0.0 }
  0xde   : > { %v695_v42 = vsel %vm663_vm6, %v630_v37, %v679_v38 }
  0xdf   : > { %v711_v44 = vmul.f32 1.4142135, %v695_v42  ;;  %v1509_v42 = vld [vmem:[%s1958_s12 + $0x8] sm:$0xff] }
  0xe1   : > { %v631_v39 = vpop.f32.mrf.mxu0 }
  0xe2   : > { %v632_v40 = vadd.f32 %v631_v39, %v489_v6 }
  0xe4   : > { %vm664_vm7 = vcmp.ge.f32.partialorder %v632_v40, 0.0  ;;  %v680_v41 = vmul.f32 0.2, %v632_v40 }
  0xe6   : > { %v696_v43 = vsel %vm664_vm7, %v632_v40, %v680_v41  ;;  %v1508_v40 = vld [vmem:[%s1958_s12] sm:$0xff]  ;;  %v1514_v41 = vld [vmem:[%s1958_s12 + $0x30] sm:$0xff] }
  0xe7   : > { %v712_v45 = vmul.f32 1.4142135, %v696_v43  ;;  %v1510_v43 = vld [vmem:[%s1958_s12 + $0x10] sm:$0xff] }
  0xe9   : > { %v634_v46 = vpop.f32.mrf.mxu0  ;;  %v1940_v47 = vpack.c.bf16 %v712_v45, %v711_v44  ;;  %v1511_v44 = vld [vmem:[%s1958_s12 + $0x18] sm:$0xff]  ;;  %v1512_v45 = vld [vmem:[%s1958_s12 + $0x20] sm:$0xff] }
  0xea   : > { %v635_v48 = vadd.f32 %v634_v46, %v494_v2  ;;  %v1513_v46 = vld [vmem:[%s1958_s12 + $0x28] sm:$0xff] }
  0xec   : > { %v681_v49 = vmul.f32 0.2, %v635_v48  ;;  %vm665_vm8 = vcmp.ge.f32.partialorder %v635_v48, 0.0 }
  0xee   : > { %v697_v53 = vsel %vm665_vm8, %v635_v48, %v681_v49  ;;  %v827_v48 = vpop.permute.xlu0 %826 }
  0xef   : > { %v713_v55 = vmul.f32 1.4142135, %v697_v53 }
  0xf1   : > { %v636_v50 = vpop.f32.mrf.mxu0 }
  0xf2   : > { %v637_v51 = vadd.f32 %v636_v50, %v499_v8 }
  0xf4   : > { %vm666_vm9 = vcmp.ge.f32.partialorder %v637_v51, 0.0  ;;  %v682_v52 = vmul.f32 0.2, %v637_v51 }
  0xf6   : > { %v698_v54 = vsel %vm666_vm9, %v637_v51, %v682_v52  ;;  %v1970_v50 = vpop.permute.xlu0 %821  ;;  %v842_v52 = vpop.permute.xlu2 %841 }
  0xf7   : > { %v714_v56 = vmul.f32 1.4142135, %v698_v54 }
  0xf9   : > { %v639_v57 = vpop.f32.mrf.mxu0  ;;  %v742_v59 = vpack.c.bf16 %v714_v56, %v713_v55 }
  0xfe   : > { %v1974_v51 = vpop.permute.xlu0 %796  ;;  %v1980_v55 = vpop.permute.xlu2 %816 }
 0x101   : > { %v641_v63 = vpop.f32.mrf.mxu0 }
 0x106   : > { %v1978_v54 = vpop.permute.xlu0 %791 }
 0x109   : > { %v644_v0 = vpop.f32.mrf.mxu0 }
 0x10a   : > { %v645_v17 = vadd.f32 %v644_v0, %v1908_v58  ;;  %v1982_v0 = vpop.permute.xlu2 %811 }
 0x10c   : > { %v685_v24 = vmul.f32 0.2, %v645_v17  ;;  %vm669_vm15 = vcmp.ge.f32.partialorder %v645_v17, 0.0 }
 0x10e   : > { %v701_v30 = vsel %vm669_vm15, %v645_v17, %v685_v24 }
 0x111   : > { %v646_v4 = vpop.f32.mrf.mxu0 }
 0x112   : > { %v647_v14 = vadd.f32 %v646_v4, %v1916_v61  ;;  %v640_v61 = vadd.f32 %v639_v57, %v1932_v5  ;;  %v717_v5 = vmul.f32 1.4142135, %v701_v30 }
 0x114   : > { %vm670_vm14 = vcmp.ge.f32.partialorder %v647_v14, 0.0  ;;  %vm667_vm1 = vcmp.ge.f32.partialorder %v640_v61, 0.0 }
 0x119   : > { %v649_v6 = vpop.f32.mrf.mxu0 }
 0x11a   : > { %v650_v8 = vadd.f32 %v649_v6, %v1918_v62 }
 0x11c   : > { %v687_v18 = vmul.f32 0.2, %v650_v8  ;;  %vm671_vm13 = vcmp.ge.f32.partialorder %v650_v8, 0.0 }
 0x121   : > { %v651_v7 = vpop.f32.mrf.mxu0 }
 0x122   : > { %v652_v11 = vadd.f32 %v651_v7, %v1927_v3  ;;  %v686_v3 = vmul.f32 0.2, %v647_v14 }
 0x124   : > { %v688_v15 = vmul.f32 0.2, %v652_v11  ;;  %vm672_vm11 = vcmp.ge.f32.partialorder %v652_v11, 0.0  ;;  %v702_v27 = vsel %vm670_vm14, %v647_v14, %v686_v3 }
 0x125   : > { %v718_v32 = vmul.f32 1.4142135, %v702_v27 }
 0x126   : > { %v704_v21 = vsel %vm672_vm11, %v652_v11, %v688_v15 }
 0x127   : > { %v720_v25 = vmul.f32 1.4142135, %v704_v21  ;;  %v744_v35 = vpack.c.bf16 %v718_v32, %v717_v5 }
 0x129   : > { %v654_v10 = vpop.f32.mrf.mxu0 }
 0x12a   : > { %v655_v2 = vadd.f32 %v654_v10, %v1914_v60  ;;  %v642_v60 = vadd.f32 %v641_v63, %v1934_v9  ;;  %v683_v9 = vmul.f32 0.2, %v640_v61 }
 0x12c   : > { %v689_v12 = vmul.f32 0.2, %v655_v2  ;;  %vm673_vm10 = vcmp.ge.f32.partialorder %v655_v2, 0.0  ;;  %v684_v26 = vmul.f32 0.2, %v642_v60  ;;  %vm668_vm0 = vcmp.ge.f32.partialorder %v642_v60, 0.0 }
 0x12d   : > { %v699_v34 = vsel %vm667_vm1, %v640_v61, %v683_v9 }
 0x12e   : > { %v705_v20 = vsel %vm673_vm10, %v655_v2, %v689_v12  ;;  %v700_v33 = vsel %vm668_vm0, %v642_v60, %v684_v26  ;;  %v715_v38 = vmul.f32 1.4142135, %v699_v34 }
 0x12f   : > { %v721_v22 = vmul.f32 1.4142135, %v705_v20  ;;  %v716_v37 = vmul.f32 1.4142135, %v700_v33 }
 0x131   : > { %v656_v13 = vpop.f32.mrf.mxu0  ;;  %v743_v39 = vpack.c.bf16 %v716_v37, %v715_v38 }
 0x132   : > { %v657_v16 = vadd.f32 %v656_v13, %v1924_v1  ;;  %v703_v1 = vsel %vm671_vm13, %v650_v8, %v687_v18  ;;  %v1984_v13 = vpop.permute.xlu2 %786 }
 0x133   : > { %v719_v28 = vmul.f32 1.4142135, %v703_v1 }
 0x134   : > { %vm674_vm12 = vcmp.ge.f32.partialorder %v657_v16, 0.0  ;;  %v690_v19 = vmul.f32 0.2, %v657_v16 }
 0x135   : > { %v745_v31 = vpack.c.bf16 %v720_v25, %v719_v28 }
 0x136   : > { %v706_v62 = vsel %vm674_vm12, %v657_v16, %v690_v19 }
 0x137   : > { %v722_v23 = vmul.f32 1.4142135, %v706_v62 }
 0x139   : > { %v746_v58 = vpack.c.bf16 %v722_v23, %v721_v22 }
 0x13a   : > { %v782_v3 = vpop.permute.xlu2 %781 }
 0x13b   : > { %892 = vmatpush.bf16.msra.mxu1 %v746_v58  ;;  %1525 = vmatpush.bf16.msra.mxu3 %v746_v58 }
 0x13f   : > { %893 = vmatpush.bf16.msra.mxu1 %v745_v31  ;;  %1526 = vmatpush.bf16.msra.mxu3 %v745_v31 }
 0x143   : > { %894 = vmatpush.bf16.msra.mxu1 %v744_v35  ;;  %1527 = vmatpush.bf16.msra.mxu3 %v744_v35 }
 0x147   : > { %895 = vmatpush.bf16.msra.mxu1 %v743_v39  ;;  %1528 = vmatpush.bf16.msra.mxu3 %v743_v39 }
 0x14b   : > { %896 = vmatpush.bf16.msra.mxu1 %v742_v59  ;;  %1529 = vmatpush.bf16.msra.mxu3 %v742_v59  ;;  %v767_v59 = vpop.permute.xlu0 %766 }
 0x14f   : > { %897 = vmatpush.bf16.msra.mxu1 %v1940_v47  ;;  %1530 = vmatpush.bf16.msra.mxu3 %v1940_v47  ;;  %v837_v47 = vpop.permute.xlu1 %836 }
 0x153   : > { %898 = vmatpush.bf16.msra.mxu1 %v1938_v36  ;;  %1531 = vmatpush.bf16.msra.mxu3 %v1938_v36  ;;  %v1515_v36 = vld [vmem:[%s1958_s12 + $0x38] sm:$0xff] }
 0x157   : > { %899 = vmatpush.bf16.msra.mxu1 %v1936_v29  ;;  %1532 = vmatpush.bf16.msra.mxu3 %v1936_v29  ;;  %v832_v49 = vpop.permute.xlu1 %831 }
 0x15a   : > { %900 = vmatmul.bf16.vlgmr.msra.gmra.mxu1 %v1508_v40  ;;  %930 = vmatmul.bf16.vlgmr.msra.gmra.mxu3 %v1514_v41 }
 0x15f   : > { %v1972_v29 = vpop.permute.xlu1 %806 }
 0x167   : > { %v1976_v53 = vpop.permute.xlu1 %801 }
 0x16a   : > { %905 = vmatmul.bf16.gmra.mxu1 %v1509_v42  ;;  %935 = vmatmul.bf16.gmra.mxu3 %v1515_v36 }
 0x16f   : > { %v777_v56 = vpop.permute.xlu1 %776 }
 0x177   : > { %v772_v7 = vpop.permute.xlu1 %771 }
 0x17a   : > { %910 = vmatmul.bf16.gmra.mxu1 %v1510_v43 }
 0x18a   : > { %915 = vmatmul.bf16.gmra.mxu1 %v1511_v44 }
 0x19a   : > { %920 = vmatmul.bf16.gmra.mxu1 %v1512_v45 }
 0x1aa   : > { %925 = vmatmul.bf16.gmra.mxu1 %v1513_v46 }
 0x1d7   : > { %v901_v57 = vpop.f32.mrf.mxu1 }
 0x1d8   : > { %v902_v63 = vadd.f32 %v901_v57, %v767_v59 }
 0x1da   : > { %v957_v6 = vmul.f32 0.2, %v902_v63  ;;  %vm941_vm2 = vcmp.ge.f32.partialorder %v902_v63, 0.0 }
 0x1dc   : > { %v973_v8 = vsel %vm941_vm2, %v902_v63, %v957_v6 }
 0x1dd   : > { %v931_v4 = vpop.f32.mrf.mxu3  ;;  %v989_v15 = vmul.f32 1.4142135, %v973_v8 }
 0x1de   : > { %v932_v1 = vadd.f32 %v931_v4, %v827_v48 }
 0x1df   : > { %v903_v10 = vpop.f32.mrf.mxu1 }
 0x1e0   : > { %v904_v2 = vadd.f32 %v903_v10, %v772_v7  ;;  %v969_v33 = vmul.f32 0.2, %v932_v1  ;;  %vm953_vm9 = vcmp.ge.f32.partialorder %v932_v1, 0.0 }
 0x1e2   : > { %vm942_vm3 = vcmp.ge.f32.partialorder %v904_v2, 0.0  ;;  %v958_v11 = vmul.f32 0.2, %v904_v2  ;;  %v985_v40 = vsel %vm953_vm9, %v932_v1, %v969_v33  ;;  %v1050_v33 = vpop.permute.xlu2 %1049 }
 0x1e3   : > { %v1001_v43 = vmul.f32 1.4142135, %v985_v40 }
 0x1e4   : > { %v974_v12 = vsel %vm942_vm3, %v904_v2, %v958_v11 }
 0x1e5   : > { %v933_v14 = vpop.f32.mrf.mxu3  ;;  %v990_v16 = vmul.f32 1.4142135, %v974_v12 }
 0x1e6   : > { %v934_v23 = vadd.f32 %v933_v14, %v832_v49 }
 0x1e7   : > { %v906_v17 = vpop.f32.mrf.mxu1  ;;  %v1986_v18 = vpack.c.bf16 %v990_v16, %v989_v15 }
 0x1e8   : > { %v907_v19 = vadd.f32 %v906_v17, %v777_v56  ;;  %v970_v9 = vmul.f32 0.2, %v934_v23  ;;  %vm954_vm7 = vcmp.ge.f32.partialorder %v934_v23, 0.0 }
 0x1ea   : > { %v959_v60 = vmul.f32 0.2, %v907_v19  ;;  %vm943_vm4 = vcmp.ge.f32.partialorder %v907_v19, 0.0  ;;  %v986_v37 = vsel %vm954_vm7, %v934_v23, %v970_v9  ;;  %v1523_v9 = vld [vmem:[%s1958_s12 + $0x78] sm:$0xff] }
 0x1eb   : > { %v1002_v42 = vmul.f32 1.4142135, %v986_v37 }
 0x1ec   : > { %v975_v24 = vsel %vm943_vm4, %v907_v19, %v959_v60 }
 0x1ed   : > { %v936_v20 = vpop.f32.mrf.mxu3  ;;  %v991_v27 = vmul.f32 1.4142135, %v975_v24  ;;  %v1028_v44 = vpack.c.bf16 %v1002_v42, %v1001_v43 }
 0x1ee   : > { %v937_v21 = vadd.f32 %v936_v20, %v837_v47 }
 0x1ef   : > { %v908_v62 = vpop.f32.mrf.mxu1 }
 0x1f0   : > { %v909_v22 = vadd.f32 %v908_v62, %v782_v3  ;;  %v971_v58 = vmul.f32 0.2, %v937_v21  ;;  %vm955_vm6 = vcmp.ge.f32.partialorder %v937_v21, 0.0 }
 0x1f2   : > { %vm944_vm5 = vcmp.ge.f32.partialorder %v909_v22, 0.0  ;;  %v960_v61 = vmul.f32 0.2, %v909_v22  ;;  %v987_v34 = vsel %vm955_vm6, %v937_v21, %v971_v58 }
 0x1f3   : > { %v1003_v38 = vmul.f32 1.4142135, %v987_v34 }
 0x1f4   : > { %v976_v25 = vsel %vm944_vm5, %v909_v22, %v960_v61 }
 0x1f5   : > { %v938_v26 = vpop.f32.mrf.mxu3  ;;  %v992_v28 = vmul.f32 1.4142135, %v976_v25  ;;  %v1516_v25 = vld [vmem:[%s1958_s12 + $0x40] sm:$0xff] }
 0x1f6   : > { %v939_v30 = vadd.f32 %v938_v26, %v842_v52  ;;  %v1517_v26 = vld [vmem:[%s1958_s12 + $0x48] sm:$0xff] }
 0x1f7   : > { %v911_v31 = vpop.f32.mrf.mxu1  ;;  %v1988_v32 = vpack.c.bf16 %v992_v28, %v991_v27  ;;  %v1522_v27 = vld [vmem:[%s1958_s12 + $0x70] sm:$0xff] }
 0x1f8   : > { %vm956_vm8 = vcmp.ge.f32.partialorder %v939_v30, 0.0  ;;  %v972_v5 = vmul.f32 0.2, %v939_v30  ;;  %v1518_v28 = vld [vmem:[%s1958_s12 + $0x50] sm:$0xff] }
 0x1fa   : > { %v988_v35 = vsel %vm956_vm8, %v939_v30, %v972_v5  ;;  %v1519_v30 = vld [vmem:[%s1958_s12 + $0x58] sm:$0xff] }
 0x1fb   : > { %v1004_v39 = vmul.f32 1.4142135, %v988_v35 }
 0x1fd   : > { %v1029_v41 = vpack.c.bf16 %v1004_v39, %v1003_v38  ;;  %v1055_v38 = vpop.permute.xlu0 %1054 }
 0x1ff   : > { %v913_v36 = vpop.f32.mrf.mxu1  ;;  %1161 = vmatpush.bf16.msra.mxu2 %v1029_v41  ;;  %1533 = vmatpush.bf16.msrb.mxu3 %v1029_v41 }
 0x203   : > { %1162 = vmatpush.bf16.msra.mxu2 %v1028_v44  ;;  %1534 = vmatpush.bf16.msrb.mxu3 %v1028_v44 }
 0x207   : > { %v916_v45 = vpop.f32.mrf.mxu1 }
 0x208   : > { %v917_v10 = vadd.f32 %v916_v45, %v1974_v51 }
 0x20a   : > { %v963_v16 = vmul.f32 0.2, %v917_v10  ;;  %vm947_vm15 = vcmp.ge.f32.partialorder %v917_v10, 0.0 }
 0x20c   : > { %v979_v3 = vsel %vm947_vm15, %v917_v10, %v963_v16 }
 0x20f   : > { %v918_v46 = vpop.f32.mrf.mxu1 }
 0x210   : > { %v919_v4 = vadd.f32 %v918_v46, %v1976_v53  ;;  %v912_v53 = vadd.f32 %v911_v31, %v1984_v13  ;;  %v995_v13 = vmul.f32 1.4142135, %v979_v3  ;;  %v1520_v31 = vld [vmem:[%s1958_s12 + $0x60] sm:$0xff] }
 0x212   : > { %vm948_vm14 = vcmp.ge.f32.partialorder %v919_v4, 0.0  ;;  %vm945_vm1 = vcmp.ge.f32.partialorder %v912_v53, 0.0 }
 0x217   : > { %v921_v47 = vpop.f32.mrf.mxu1 }
 0x218   : > { %v922_v57 = vadd.f32 %v921_v47, %v1972_v29 }
 0x21a   : > { %v965_v2 = vmul.f32 0.2, %v922_v57  ;;  %vm949_vm13 = vcmp.ge.f32.partialorder %v922_v57, 0.0 }
 0x21f   : > { %v923_v48 = vpop.f32.mrf.mxu1 }
 0x220   : > { %v924_v56 = vadd.f32 %v923_v48, %v1982_v0  ;;  %v964_v0 = vmul.f32 0.2, %v919_v4 }
 0x222   : > { %v966_v6 = vmul.f32 0.2, %v924_v56  ;;  %vm950_vm11 = vcmp.ge.f32.partialorder %v924_v56, 0.0  ;;  %v980_v20 = vsel %vm948_vm14, %v919_v4, %v964_v0 }
 0x223   : > { %v996_v21 = vmul.f32 1.4142135, %v980_v20 }
 0x224   : > { %v982_v12 = vsel %vm950_vm11, %v924_v56, %v966_v6 }
 0x225   : > { %v998_v17 = vmul.f32 1.4142135, %v982_v12  ;;  %v1025_v61 = vpack.c.bf16 %v996_v21, %v995_v13 }
 0x227   : > { %v926_v49 = vpop.f32.mrf.mxu1 }
 0x228   : > { %v927_v52 = vadd.f32 %v926_v49, %v1980_v55  ;;  %v914_v55 = vadd.f32 %v913_v36, %v1978_v54  ;;  %v961_v54 = vmul.f32 0.2, %v912_v53 }
 0x22a   : > { %v967_v59 = vmul.f32 0.2, %v927_v52  ;;  %vm951_vm10 = vcmp.ge.f32.partialorder %v927_v52, 0.0  ;;  %v962_v19 = vmul.f32 0.2, %v914_v55  ;;  %vm946_vm0 = vcmp.ge.f32.partialorder %v914_v55, 0.0 }
 0x22b   : > { %v977_v23 = vsel %vm945_vm1, %v912_v53, %v961_v54 }
 0x22c   : > { %v983_v8 = vsel %vm951_vm10, %v927_v52, %v967_v59  ;;  %v978_v22 = vsel %vm946_vm0, %v914_v55, %v962_v19  ;;  %v993_v1 = vmul.f32 1.4142135, %v977_v23 }
 0x22d   : > { %v999_v14 = vmul.f32 1.4142135, %v983_v8  ;;  %v994_v24 = vmul.f32 1.4142135, %v978_v22 }
 0x22f   : > { %v928_v63 = vpop.f32.mrf.mxu1  ;;  %v1024_v58 = vpack.c.bf16 %v994_v24, %v993_v1 }
 0x230   : > { %v929_v7 = vadd.f32 %v928_v63, %v1970_v50  ;;  %v981_v50 = vsel %vm949_vm13, %v922_v57, %v965_v2 }
 0x231   : > { %v997_v60 = vmul.f32 1.4142135, %v981_v50 }
 0x232   : > { %vm952_vm12 = vcmp.ge.f32.partialorder %v929_v7, 0.0  ;;  %v968_v11 = vmul.f32 0.2, %v929_v7 }
 0x233   : > { %v1026_v62 = vpack.c.bf16 %v998_v17, %v997_v60 }
 0x234   : > { %v984_v29 = vsel %vm952_vm12, %v929_v7, %v968_v11 }
 0x235   : > { %v1000_v15 = vmul.f32 1.4142135, %v984_v29 }
 0x237   : > { %v1027_v51 = vpack.c.bf16 %v1000_v15, %v999_v14 }
 0x239   : > { %1163 = vmatpush.bf16.msra.mxu2 %v1027_v51  ;;  %1535 = vmatpush.bf16.msrb.mxu3 %v1027_v51 }
 0x23d   : > { %1164 = vmatpush.bf16.msra.mxu2 %v1026_v62  ;;  %1536 = vmatpush.bf16.msrb.mxu3 %v1026_v62 }
 0x241   : > { %1165 = vmatpush.bf16.msra.mxu2 %v1025_v61  ;;  %1537 = vmatpush.bf16.msrb.mxu3 %v1025_v61 }
 0x245   : > { %1166 = vmatpush.bf16.msra.mxu2 %v1024_v58  ;;  %1538 = vmatpush.bf16.msrb.mxu3 %v1024_v58 }
 0x249   : > { %1167 = vmatpush.bf16.msra.mxu2 %v1988_v32  ;;  %1539 = vmatpush.bf16.msrb.mxu3 %v1988_v32  ;;  %v1521_v32 = vld [vmem:[%s1958_s12 + $0x68] sm:$0xff] }
 0x24d   : > { %1168 = vmatpush.bf16.msra.mxu2 %v1986_v18  ;;  %1540 = vmatpush.bf16.msrb.mxu3 %v1986_v18 }
 0x250   : > { %1169 = vmatmul.bf16.vlgmr.msra.gmra.mxu2 %v1516_v25  ;;  %1189 = vmatmul.bf16.vlgmr.msrb.gmra.mxu3 %v1522_v27 }
 0x260   : > { %1174 = vmatmul.bf16.gmra.mxu2 %v1517_v26  ;;  %1192 = vmatmul.bf16.gmra.mxu3 %v1523_v9 }
 0x270   : > { %1177 = vmatmul.bf16.gmra.mxu2 %v1518_v28 }
 0x280   : > { %1180 = vmatmul.bf16.gmra.mxu2 %v1519_v30 }
 0x290   : > { %1183 = vmatmul.bf16.gmra.mxu2 %v1520_v31 }
 0x2a0   : > { %1186 = vmatmul.bf16.gmra.mxu2 %v1521_v32 }
 0x2d3   : > { %v1170_v5 = vpop.f32.mrf.mxu2 }
 0x2d4   : > { %v1171_v18 = vadd.f32 %v1170_v5, %v1050_v33 }
 0x2d6   : > { %vm1196_vm2 = vcmp.ge.f32.partialorder %v1171_v18, 0.0  ;;  %v1198_v34 = vmul.f32 0.2, %v1171_v18 }
 0x2d8   : > { %v1200_v35 = vsel %vm1196_vm2, %v1171_v18, %v1198_v34 }
 0x2d9   : > { %v1202_v37 = vmul.f32 1.4142135, %v1200_v35 }
 0x2db   : > { %1204 = vst [vmem:[%s413_s26] sm:$0xff] %v1202_v37  ;;  %v1172_v39 = vpop.f32.mrf.mxu2 }
 0x2dc   : > { %v1173_v40 = vadd.f32 %v1172_v39, %v1055_v38 }
 0x2de   : > { %vm1197_vm3 = vcmp.ge.f32.partialorder %v1173_v40, 0.0  ;;  %v1199_v41 = vmul.f32 0.2, %v1173_v40 }
 0x2e0   : > { %v1201_v42 = vsel %vm1197_vm3, %v1173_v40, %v1199_v41 }
 0x2e1   : > { %v1203_v36 = vmul.f32 1.4142135, %v1201_v42 }
 0x2e3   : > { %1205 = vst [vmem:[%s413_s26 + $0x8] sm:$0xff] %v1203_v36  ;;  %v1175_v43 = vpop.f32.mrf.mxu2 }
 0x2e4   : > { %1629 = shalt.err (!%p1626_p8)
}
 0x2e5   : > { %s1683_s8 = smov 128   ;;  %s1684_s13 = smov 8   ;;  %v1190_v44 = vpop.f32.mrf.mxu3 }
 0x2e6   : > { %1541 = dma.vmem_to_hbm [thread:$0]  (%p1749_p5), %s1221_s29, 256, %s1223_s30, %s1207_s18, %s1683_s8, %s1683_s8, %s1684_s13  }
 0x2eb   : > { %v1176_v45 = vpop.f32.mrf.mxu2 }
 0x2ed   : > { %v1191_v46 = vpop.f32.mrf.mxu3 }
 0x2f3   : > { %v1178_v47 = vpop.f32.mrf.mxu2 }
 0x2f5   : > { %v1193_v48 = vpop.f32.mrf.mxu3 }
 0x2fb   : > { %v1179_v49 = vpop.f32.mrf.mxu2 }
 0x2fd   : > { %v1194_v52 = vpop.f32.mrf.mxu3 }
 0x303   : > { %v1181_v56 = vpop.f32.mrf.mxu2 }
 0x30b   : > { %v1182_v57 = vpop.f32.mrf.mxu2 }
 0x313   : > { %v1184_v59 = vpop.f32.mrf.mxu2 }
 0x31b   : > { %v1185_v63 = vpop.f32.mrf.mxu2 }
 0x323   : > { %v1187_v4 = vpop.f32.mrf.mxu2 }
 0x32b   : > { %v1188_v6 = vpop.f32.mrf.mxu2 }
 0x32c PF: > { %s1237_s14 = sand.u32 1, %s1660_s15   ;;  %p1544_p5 = pnand %p1331_p10, %p1760_p9 }
 0x32d   : > { %s1238_s25 = scalar_lea.sflag [#allocation4], %s1237_s14 }
 0x32e   : > { %p1545_p11 = pneg %p1544_p5 }
 0x330   : > { %1655 = dma.done.wait (%p1545_p11), %s1238_s25, 256  }
 0x331   : > { %1657 = vsyncadd (%p1545_p11), %s1238_s25, 4294967040  ;;  %s17_s20 = sadd.s32 1, %s1680_s20   ;;  %s2056_s15 = smov %s1664_s16 }
 0x332   : > { %p14_p12 = scmp.ge.s32.totalorder %s17_s20, 4   ;;  %s2057_s16 = smov %s1668_s17 }
 0x333   : > { %s2058_s17 = smov %s1758_s27  ;;  %s2059_s18 = smov %s1676_s19 }
 0x334   : > { %s2060_s19 = smov %s2062_s23  ;;  %16 = sbr.rel (!%p14_p12) target bundleno = 4 (0x4), region = 126 }
 0x339   :  { %1244 = vsyncpa [#allocation4], 1 }
 0x33a   :  { %1246 = vsyncpa [#allocation4 + $0x1], 1 }

</bundles_post_ra>
